<compile_context>
chip_gen: v5e
topology: v5e:2x2
jax: 0.10.0
libtpu: 0.0.40
codegen_flags: <defaults>
</compile_context>

<pallas_src>
import functools
import math

import jax
import jax.numpy as jnp
from jax.experimental import pallas as pl
from jax.experimental.pallas import tpu as pltpu


def _rel_pos_emb_kernel(freq_ref, o_ref, *, seq_len, half_dim, pad_block,
                        pad_local, split_store):
    """Compute one (block_rows, embedding_dim) block of the embedding.

    freq_ref : (1, half_dim) f32 when split_store else (1, embedding_dim)
               f32 with the frequencies duplicated [f, f].
    o_ref    : (block_rows, embedding_dim) output block.
    """
    block_rows, dim = o_ref.shape
    i = pl.program_id(0)

    # Relative position p for each row of this block: p = global_row - seq_len
    # (positions = arange(-seq_len, seq_len) in the PyTorch forward).
    rows = jax.lax.broadcasted_iota(jnp.int32, (block_rows, 1), 0)
    pos = (rows + (i * block_rows - seq_len)).astype(jnp.float32)   # (R, 1)

    if split_store:
        # Lane-aligned split: compute phase once at half width, store halves.
        phase = pos * freq_ref[...]                                 # (R, half)
        o_ref[:, :half_dim] = jnp.sin(phase).astype(o_ref.dtype)
        o_ref[:, half_dim:] = jnp.cos(phase).astype(o_ref.dtype)
    else:
        # Fallback for half_dim % 128 != 0 (lane-misaligned split): full-width
        # phase with duplicated freqs + select.  Only hit for small D.
        phase = pos * freq_ref[...]                                 # (R, dim)
        cols = jax.lax.broadcasted_iota(jnp.int32, (1, dim), 1)
        o_ref[...] = jnp.where(cols < half_dim, jnp.sin(phase),
                               jnp.cos(phase)).astype(o_ref.dtype)

    # The precomputed table zeroes its row at index padding_idx; that row is
    # gathered exactly when p + origin_shift == padding_idx.  pad_block /
    # pad_local are static; only the one affected grid block pays anything.
    if pad_block is not None:
        @pl.when(i == pad_block)
        def _():
            o_ref[pl.ds(pad_local, 1), :] = jnp.zeros((1, dim), o_ref.dtype)


def relative_sinusoidal_positional_embedding(seq_len, embedding_dim,
                                             padding_idx=0, init_size=1568,
                                             out_dtype=jnp.float32):
    """Pallas equivalent of RelativeSinusoidalPositionalEmbedding.forward(seq_len)."""
    if init_size % 2 != 0:
        raise ValueError("init_size must be even")
    if embedding_dim % 2 != 0:
        # TODO(synk): odd embedding_dim (extra zero column in the table) unsupported.
        raise ValueError("odd embedding_dim is not supported")

    # Table bookkeeping matching the PyTorch module (seq_len is a Python int,
    # so the "regrow the table" branch resolves at trace time).
    num_embeddings = init_size + 1
    origin_shift = num_embeddings // 2 + 1
    max_pos = padding_idx + seq_len
    if max_pos > origin_shift:
        # PyTorch rebuilds a (max_pos*2, D) table; origin_shift becomes max_pos.
        origin_shift = max_pos

    half_dim = embedding_dim // 2
    log_step = math.log(10000) / (half_dim - 1)
    freqs_half = jnp.exp(jnp.arange(half_dim, dtype=jnp.float32) * -log_step)

    split_store = (half_dim % 128 == 0)
    if split_store:
        freqs = freqs_half.reshape(1, half_dim)
    else:
        freqs = jnp.concatenate([freqs_half, freqs_half]).reshape(1, embedding_dim)
    freq_cols = freqs.shape[1]

    total_rows = 2 * seq_len
    itemsize = jnp.dtype(out_dtype).itemsize

    # Block sizing: multiple of 8 rows, <= 4 MiB per block (v7x-safe with
    # double buffering), <= 2048 rows, and <= ~half the rows so non-trivial
    # sizes get >= 2 grid steps (lets v7x shard the "parallel" axis over its
    # two TensorCores).  Tiny outputs (< 8 rows) use a full-extent block.
    max_rows_vmem = max(8, ((4 * 1024 * 1024) // (embedding_dim * itemsize)) // 8 * 8)
    half_rows = max(8, (((total_rows + 1) // 2) + 7) // 8 * 8)
    block_rows = min(2048, max_rows_vmem, half_rows)
    if total_rows < 8:
        block_rows = total_rows
    grid = (pl.cdiv(total_rows, block_rows),)

    # Output row that maps to the zeroed table row (padding_idx); static.
    pad_row = padding_idx - origin_shift + seq_len
    if 0 <= pad_row < total_rows:
        pad_block, pad_local = pad_row // block_rows, pad_row % block_rows
    else:
        pad_block, pad_local = None, 0

    kernel = functools.partial(
        _rel_pos_emb_kernel,
        seq_len=seq_len,
        half_dim=half_dim,
        pad_block=pad_block,
        pad_local=pad_local,
        split_store=split_store,
    )

    return pl.pallas_call(
        kernel,
        out_shape=jax.ShapeDtypeStruct((total_rows, embedding_dim), out_dtype),
        grid_spec=pltpu.PrefetchScalarGridSpec(
            num_scalar_prefetch=0,
            grid=grid,
            in_specs=[
                pl.BlockSpec((1, freq_cols), lambda i: (0, 0)),   # freqs
            ],
            out_specs=pl.BlockSpec((block_rows, embedding_dim),
                                   lambda i: (i, 0)),
        ),
        compiler_params=pltpu.CompilerParams(
            dimension_semantics=("parallel",),
            vmem_limit_bytes=24 * 1024 * 1024),
    )(freqs)


def relative_sinusoidal_positional_embedding_ref(seq_len, embedding_dim,
                                                 padding_idx=0, init_size=1568):
    """Pure-JAX reference replicating the PyTorch table build + index_select."""
    num_embeddings = init_size + 1
    origin_shift = num_embeddings // 2 + 1
    max_pos = padding_idx + seq_len
    if max_pos > origin_shift:
        num_embeddings = max_pos * 2
        origin_shift = num_embeddings // 2

    half_dim = embedding_dim // 2
    log_step = math.log(10000) / (half_dim - 1)
    freqs = jnp.exp(jnp.arange(half_dim, dtype=jnp.float32) * -log_step)
    table_pos = jnp.arange(-num_embeddings // 2, num_embeddings // 2,
                           dtype=jnp.float32)
    phase = table_pos[:, None] * freqs[None, :]
    table = jnp.concatenate([jnp.sin(phase), jnp.cos(phase)], axis=1)
    if embedding_dim % 2 == 1:
        table = jnp.concatenate(
            [table, jnp.zeros((num_embeddings, 1), jnp.float32)], axis=1)
    table = table.at[padding_idx, :].set(0.0)

    positions = jnp.arange(-seq_len, seq_len) + origin_shift
    return table[positions]


if __name__ == "__main__":
    # forward(seq_len) takes only an integer; the sinusoidal table is fully
    # deterministic, so there are no tensor inputs to randomize.
    _ = jax.random.PRNGKey(0)

    # 1) Small config (D=32, seq_len=8) -> (16, 32): fallback path, 2 grid steps.
    out = relative_sinusoidal_positional_embedding(8, 32)
    out = jax.block_until_ready(out)
    ref = relative_sinusoidal_positional_embedding_ref(8, 32)
    assert out.shape == (16, 32)
    assert jnp.allclose(out, ref, rtol=1e-5, atol=1e-5), "mismatch (small)"

    # 2) Ragged-rows config (D=32, seq_len=7) -> (14, 32): ragged last block.
    out_r = relative_sinusoidal_positional_embedding(7, 32)
    out_r = jax.block_until_ready(out_r)
    ref_r = relative_sinusoidal_positional_embedding_ref(7, 32)
    assert out_r.shape == (14, 32)
    assert jnp.allclose(out_r, ref_r, rtol=1e-5, atol=1e-5), "mismatch (ragged)"

    # 3) Lane-aligned split-store path (D=256, seq_len=512) -> (1024, 256),
    #    2 grid steps of 512 rows each.
    out2 = relative_sinusoidal_positional_embedding(512, 256)
    out2 = jax.block_until_ready(out2)
    ref2 = relative_sinusoidal_positional_embedding_ref(512, 256)
    assert out2.shape == (1024, 256)
    # Looser atol: large sin/cos arguments -> range-reduction differences
    # between the in-kernel and XLA transcendental implementations.
    assert jnp.allclose(out2, ref2, rtol=1e-5, atol=5e-4), "mismatch (split)"

    # 4) Table-regrow path (seq_len > origin_shift) with the padding row
    #    actually gathered (output row 0 must be zero).
    out3 = relative_sinusoidal_positional_embedding(800, 64)
    out3 = jax.block_until_ready(out3)
    ref3 = relative_sinusoidal_positional_embedding_ref(800, 64)
    assert out3.shape == (1600, 64)
    assert jnp.all(out3[0] == 0.0), "padding row not zeroed"
    assert jnp.allclose(out3, ref3, rtol=1e-5, atol=1e-3), "mismatch (regrow)"

    print("KERNEL_OK")
</pallas_src>

<mosaic_0001>
module attributes {stable_mosaic.version = 11 : i64} {
  func.func @_rel_pos_emb_kernel(%arg0: i32, %arg1: memref<1x32xf32, #tpu.memory_space<vmem>>, %arg2: memref<8x32xf32, #tpu.memory_space<vmem>>) attributes {dimension_semantics = [#tpu.dimension_semantics<parallel>], iteration_bounds = array<i64: 2>, scalar_prefetch = 0 : i64, scratch_operands = 0 : i64, tpu.core_type = #tpu.core_type<tc>, window_params = [{pipeline_mode = #tpu.pipeline_mode<synchronous>, transform_indices = @transform_0, window_bounds = array<i64: 1, 32>}, {transform_indices = @transform_1, window_bounds = array<i64: 8, 32>}]} {
    %0 = tpu.iota {dimensions = array<i32: 0>} : vector<8x1xi32>
    %c8_i32 = arith.constant 8 : i32
    %1 = arith.muli %arg0, %c8_i32 : i32
    %c8_i32_0 = arith.constant 8 : i32
    %2 = arith.subi %1, %c8_i32_0 : i32
    %3 = vector.broadcast %2 : i32 to vector<8x1xi32>
    %4 = arith.addi %0, %3 : vector<8x1xi32>
    %5 = arith.sitofp %4 : vector<8x1xi32> to vector<8x1xf32>
    %c0 = arith.constant 0 : index
    %c0_1 = arith.constant 0 : index
    %6 = vector.load %arg1[%c0, %c0_1] : memref<1x32xf32, #tpu.memory_space<vmem>>, vector<1x32xf32>
    %7 = vector.broadcast %5 : vector<8x1xf32> to vector<8x32xf32>
    %8 = vector.broadcast %6 : vector<1x32xf32> to vector<8x32xf32>
    %9 = arith.mulf %7, %8 : vector<8x32xf32>
    %10 = tpu.iota {dimensions = array<i32: 1>} : vector<1x32xi32>
    %c16_i32 = arith.constant 16 : i32
    %11 = vector.broadcast %c16_i32 : i32 to vector<1x32xi32>
    %12 = arith.cmpi slt, %10, %11 : vector<1x32xi32>
    %13 = math.sin %9 : vector<8x32xf32>
    %14 = math.cos %9 : vector<8x32xf32>
    %15 = vector.shape_cast %12 : vector<1x32xi1> to vector<1x32xi1>
    %16 = vector.broadcast %15 : vector<1x32xi1> to vector<8x32xi1>
    %17 = arith.select %16, %13, %14 : vector<8x32xi1>, vector<8x32xf32>
    %c0_2 = arith.constant 0 : index
    %c0_3 = arith.constant 0 : index
    %18 = vector.load %arg2[%c0_2, %c0_3] : memref<8x32xf32, #tpu.memory_space<vmem>>, vector<8x32xf32>
    tpu.vector_store %arg2[%c0_2, %c0_3], %17 {strides = array<i32>} : memref<8x32xf32, #tpu.memory_space<vmem>>, vector<8x32xf32>,
    return
  }
  func.func @transform_0(%arg0: i32) -> (i32, i32) {
    %c0_i32 = arith.constant 0 : i32
    %c0_i32_0 = arith.constant 0 : i32
    %c0_i32_1 = arith.constant 0 : i32
    return %c0_i32, %c0_i32_0 : i32, i32
  }
  func.func @transform_1(%arg0: i32) -> (i32, i32) {
    %c0_i32 = arith.constant 0 : i32
    %c0_i32_0 = arith.constant 0 : i32
    return %arg0, %c0_i32 : i32, i32
  }
}

</mosaic_0001>

<bundles_post_ra>
// kernel: tpu_custom_call.1
= control target key start
LH: loop header
LB: loop body
LE: loop exit
PB: predicated region body
PF: predicated region fallthrough
CT: control target
= control target key end

     0   :  { %6 = vsyncpa [#allocation3], 0  ;;  %s852_s0 = inlined_call_operand.hbm [shape: f32[1,32], index: 0, kind: input, shape index: {}]   ;;  %s853_s1 = inlined_call_operand.hbm [shape: f32[16,32], index: 1, kind: output, shape index: {}]  }
   0x1   :  { %7 = vsyncpa [#allocation4], 0 }
   0x2   :  { %9 = vsyncpa [#allocation4 + $0x1], 0  ;;  %s706_s6 = smov 0   ;;  %s708_s7 = smov 0  }
   0x3   :  { %s710_s8 = smov 0   ;;  %s712_s9 = smov 0  }
   0x4 LB: > { %s727_s10 = sadd.s32 4294967295, %s686_s9   ;;  %s514_s11 = sadd.s32 4294967294, %s686_s9   ;;  %s686_s9 = sphi %s712_s9, %s859_s9   ;;  %s682_s8 = sphi %s710_s8, %s858_s8   ;;  %s678_s7 = sphi %s708_s7, %s857_s7   ;;  %s674_s6 = sphi %s706_s6, %s856_s6  }
   0x5   : > { %s731_s12 = sadd.s32 1, %s686_s9   ;;  %s43_s13 = sadd.s32 1, %s682_s8 }
   0x6   : > { %s40_s14 = ssub.s32 %s686_s9, %s731_s12  ;;  %p53_p0 = scmp.ne.s32.totalorder %s682_s8, %s678_s7 }
   0x7   : > { %p41_p1 = scmp.eq.s32.totalorder %s40_s14, 0  ;;  %p54_p2 = scmp.eq.s32.totalorder %s727_s10, 1 }
   0x8   : > { %p59_p3 = scmp.ne.s32.totalorder %s678_s7, %s674_s6  ;;  %p60_p4 = scmp.eq.s32.totalorder %s514_s11, 1 }
   0x9   : > { %s742_s15 = scalar_select %p41_p1, %s682_s8, %s43_s13  }
   0xa   : > { %p744_p5 = por %p54_p2, %p53_p0  ;;  %p748_p6 = por %p60_p4, %p59_p3 }
   0xb   : > { %p515_p7 = scmp.ge.s32.totalorder %s686_s9, 1  ;;  %p67_p8 = scmp.lt.s32.totalorder %s686_s9, 3 }
   0xc   : > { %p546_p9 = scmp.eq.s32.totalorder %s727_s10, 0  ;;  %s79_s20 = sshll.u32 %s852_s0, 4  ;;  %s80_s20 = int_to_ptr.hbm [resolvable:$true] %s79_s20 }
   0xd   : > { %p68_p10 = pnand %p515_p7, %p67_p8  ;;  %s688_s21 = smov [#allocation2]  }
   0xe   : > { %s81_s22 = sshll.u32 %s688_s21, 4  ;;  %s82_s22 = int_to_ptr.vmem [resolvable:$true] %s81_s22 }
   0xf   : > { %p538_p11 = pneg %p68_p10  ;;  %94 = sbr.rel (%p68_p10) target bundleno = 131 (0x83), region = 24 }
  0x11   : > { %p539_p12 = pnand %p546_p9, %p538_p11 }
  0x13   : > { %541 = dma.hbm_to_vmem [thread:$0]  (!%p539_p12), %s80_s20, 16, %s82_s22, [#allocation3]  }
  0x14   : > { %665 = dma.done.wait (%p546_p9), [#allocation3], 16  }
  0x15   : > { %667 = vsyncadd (%p546_p9), [#allocation3], 4294967280  ;;  %v110_v0 = vlaneseq  ;;  %s520_s23 = sshll.u32 %s727_s10, 3  ;;  %v589_v5 = vld [vmem:[#allocation2] ss:$0 sm:$0xff]  ;;  %s107_s25 = sand.u32 1, %s678_s7  }
  0x16   : > { %s521_s24 = sadd.s32 4294967288, %s520_s23  ;;  %v689_v18 = vmov 683565275   ;;  %v690_v20 = vmov 2475754826   ;;  %s810_s26 = sshll.u32 %s107_s25, 3 }
  0x17   : > { %v111_v1 = vshrl.u32 %v110_v0, 7  ;;  %v114_v2 = vstv %s521_s24  ;;  %v691_v22 = vmov 2131351028   ;;  %v692_v24 = vmov 2102212464   ;;  %s450_s29 = scalar_lea.hbm %s853_s1, %s520_s23  ;;  %s109_s30 = scalar_lea.vmem [#allocation5], %s810_s26 }
  0x18   : > { %v693_v26 = vmov 920167782   ;;  %v694_v32 = vmov 1326507024   ;;  %s820_s2 = sshll.u32 %s109_s30, 4  ;;  %s454_s3 = sshll.u32 %s450_s29, 4  ;;  %s453_s2 = int_to_ptr.vmem [resolvable:$true] %s820_s2  ;;  %s455_s3 = int_to_ptr.hbm [resolvable:$true] %s454_s3 }
  0x19   : > { %v115_v3 = vadd.s32 %v114_v2, %v111_v1  ;;  %s440_s4 = scalar_lea.sflag [#allocation4], %s107_s25  ;;  %s634_s5 = sshra.s32 %s455_s3, 4  ;;  %s635_s5 = int_to_ptr.hbm [resolvable:$true] %s634_s5 }
  0x1a   : > { %s636_s10 = scalar_lea.hbm %s635_s5, 8  ;;  %s640_s14 = scalar_lea.hbm %s853_s1, 16 }
  0x1b   : > { %v116_v4 = vcvt.s32.f32 %v115_v3  ;;  %p637_p13 = scmp.ne.s32.totalorder %s635_s5, %s636_s10  ;;  %p641_p2 = scmp.lt.s32.totalorder %s635_s5, %s853_s1 }
  0x1c   : > { %p642_p3 = scmp.lt.s32.totalorder %s640_s14, %s636_s10 }
  0x1d   : > { %v762_v6 = vmul.f32 %v589_v5, %v116_v4  ;;  %p638_p0 = pnand %p637_p13, %p744_p5 }
  0x1e   : > { %p643_p4 = por %p642_p3, %p641_p2 }
  0x1f   : > { %v128_v7 = vand.u32 2139095040, %v762_v6  ;;  %v125_v9 = vand.u32 2147483647, %v762_v6  ;;  %vm127_vm12 = vcmp.lt.s32.totalorder %v762_v6, 0  ;;  %p639_p1 = pneg %p638_p0 }
  0x21   : > { %v129_v8 = vshrl.u32 %v128_v7, 23  ;;  %v132_v12 = vand.u32 8388607, %v125_v9  ;;  %vm126_vm13 = vcmp.le.f32.partialorder %v125_v9, 0.7853982  ;;  %p644_p7 = pnand %p643_p4, %p639_p1 }
  0x23   : > { %v522_v10 = vadd.s32 4294967169, %v129_v8  ;;  %v133_v15 = vor.u32 8388608, %v132_v12  ;;  %v695_v8 = vmov 0  }
  0x25   : > { %v135_v11 = vadd.s32 1, %v522_v10  ;;  %v771_v34 = vshll.u32 %v133_v15, 8 }
  0x27   : > { %vm136_vm0 = vcmp.gt.s32.totalorder %v135_v11, 0  ;;  %v174_v46 = vand.u32 65535, %v771_v34  ;;  %v175_v47 = vshrl.u32 %v771_v34, 16 }
  0x28   : > { %v137_v13 = vsel %vm136_vm0, %v135_v11, 0 }
  0x29   : > { %v139_v14 = vand.u32 31, %v137_v13  ;;  %v768_v16 = vshrl.u32 %v137_v13, 5 }
  0x2b   : > { %v140_v17 = vsub.s32 32, %v139_v14  ;;  %v142_v19 = vshll.u32 %v689_v18, %v139_v14  ;;  %v145_v21 = vshll.u32 %v690_v20, %v139_v14  ;;  %v148_v23 = vshll.u32 %v691_v22, %v139_v14 }
  0x2c   : > { %v151_v25 = vshll.u32 %v692_v24, %v139_v14  ;;  %v154_v27 = vshll.u32 %v693_v26, %v139_v14  ;;  %vm157_vm1 = vcmp.lt.s32.totalorder %v768_v16, 1  ;;  %vm160_vm2 = vcmp.lt.s32.totalorder %v768_v16, 4 }
  0x2d   : > { %v143_v28 = vshrl.u32 %v690_v20, %v140_v17  ;;  %v146_v29 = vshrl.u32 %v691_v22, %v140_v17  ;;  %v149_v30 = vshrl.u32 %v692_v24, %v140_v17  ;;  %v152_v31 = vshrl.u32 %v693_v26, %v140_v17 }
  0x2e   : > { %v155_v33 = vshrl.u32 %v694_v32, %v140_v17  ;;  %vm159_vm3 = vcmp.lt.s32.totalorder %v768_v16, 3  ;;  %vm158_vm4 = vcmp.lt.s32.totalorder %v768_v16, 2  ;;  %v141_v54 = vshrl.u32 %v689_v18, %v140_v17 }
  0x2f   : > { %v144_v35 = vor.u32 %v143_v28, %v142_v19  ;;  %v147_v36 = vor.u32 %v146_v29, %v145_v21  ;;  %v150_v37 = vor.u32 %v149_v30, %v148_v23  ;;  %v153_v38 = vor.u32 %v152_v31, %v151_v25 }
  0x30   : > { %v156_v39 = vor.u32 %v155_v33, %v154_v27 }
  0x31   : > { %v165_v40 = vsel %vm157_vm1, %v144_v35, %v147_v36  ;;  %v169_v41 = vsel %vm157_vm1, %v147_v36, %v150_v37  ;;  %v166_v42 = vsel %vm160_vm2, %v153_v38, 920167782  ;;  %v161_v4 = vsel %vm157_vm1, %v141_v54, %v144_v35 }
  0x32   : > { %v170_v43 = vsel %vm160_vm2, %v156_v39, 1326507024  ;;  %v167_v44 = vsel %vm159_vm3, %v150_v37, %v166_v42  ;;  %v162_v7 = vsel %vm160_vm2, %v150_v37, 2102212464 }
  0x33   : > { %v171_v45 = vsel %vm159_vm3, %v153_v38, %v170_v43  ;;  %v168_v48 = vsel %vm158_vm4, %v165_v40, %v167_v44  ;;  %v163_v19 = vsel %vm159_vm3, %v147_v36, %v162_v7 }
  0x34   : > { %v172_v49 = vsel %vm158_vm4, %v169_v41, %v171_v45  ;;  %v198_v52 = vand.u32 65535, %v168_v48  ;;  %v199_v53 = vshrl.u32 %v168_v48, 16  ;;  %v164_v27 = vsel %vm158_vm4, %v161_v4, %v163_v19 }
  0x35   : > { %v176_v50 = vand.u32 65535, %v172_v49  ;;  %v177_v51 = vshrl.u32 %v172_v49, 16  ;;  %v218_v31 = vmul.u32 %v771_v34, %v164_v27  ;;  %vm268_vm4 = vweird.f32 %v762_v6 }
  0x36   : > { %v200_v58 = vmul.u32 %v198_v52, %v174_v46  ;;  %v201_v59 = vmul.u32 %v199_v53, %v174_v46  ;;  %v202_v60 = vmul.u32 %v198_v52, %v175_v47  ;;  %v203_v1 = vmul.u32 %v199_v53, %v175_v47 }
  0x37   : > { %v178_v55 = vmul.u32 %v176_v50, %v174_v46  ;;  %v179_v56 = vmul.u32 %v177_v51, %v174_v46  ;;  %v180_v57 = vmul.u32 %v176_v50, %v175_v47  ;;  %v181_v61 = vmul.u32 %v177_v51, %v175_v47 }
  0x38   : > { %v204_v2 = vshll.u32 %v201_v59, 16  ;;  %v206_v3 = vshll.u32 %v202_v60, 16  ;;  %v205_v17 = vshrl.u32 %v201_v59, 16  ;;  %v207_v23 = vshrl.u32 %v202_v60, 16 }
  0x39   : > { %v182_v62 = vshll.u32 %v179_v56, 16  ;;  %v184_v63 = vshll.u32 %v180_v57, 16  ;;  %v183_v12 = vshrl.u32 %v179_v56, 16  ;;  %v185_v20 = vshrl.u32 %v180_v57, 16 }
  0x3a   : > { %vm208_vm6 = vc.u32 %v200_v58, %v204_v2  ;;  %v210_v11 = vadd.s32 %v204_v2, %v200_v58 }
  0x3b   : > { %vm186_vm5 = vc.u32 %v178_v55, %v182_v62  ;;  %v188_v5 = vadd.s32 %v182_v62, %v178_v55  ;;  %v209_v14 = vsel %vm208_vm6, 1, %v695_v8  ;;  %vm437_vm6 = vcmask 261120  }
  0x3c   : > { %v187_v10 = vsel %vm186_vm5, 1, %v695_v8  ;;  %v211_v18 = vadd.s32 %v209_v14, %v203_v1  ;;  %vm212_vm8 = vc.u32 %v210_v11, %v206_v3  ;;  %v214_v26 = vadd.s32 %v210_v11, %v206_v3 }
  0x3d   : > { %v189_v13 = vadd.s32 %v187_v10, %v181_v61  ;;  %vm190_vm7 = vc.u32 %v188_v5, %v184_v63  ;;  %v213_v22 = vsel %vm212_vm8, 1, %v695_v8 }
  0x3e   : > { %v191_v15 = vsel %vm190_vm7, 1, %v695_v8  ;;  %v215_v24 = vadd.s32 %v213_v22, %v211_v18 }
  0x3f   : > { %v193_v21 = vadd.s32 %v191_v15, %v189_v13  ;;  %v123_v15 = vand.u32 127, %v110_v0 }
  0x40   : > { %v216_v28 = vadd.s32 %v215_v24, %v205_v17 }
  0x41   : > { %v194_v25 = vadd.s32 %v193_v21, %v183_v12  ;;  %vm124_vm5 = vcmp.lt.s32.totalorder %v123_v15, 16 }
  0x42   : > { %v217_v30 = vadd.s32 %v216_v28, %v207_v23 }
  0x43   : > { %v195_v29 = vadd.s32 %v194_v25, %v185_v20 }
  0x44   : > { %v221_v32 = vadd.s32 1, %v217_v30 }
  0x45   : > { %vm220_vm9 = vc.u32 %v195_v29, %v214_v26  ;;  %v219_v16 = vadd.s32 %v214_v26, %v195_v29 }
  0x46   : > { %v222_v33 = vsel %vm220_vm9, %v221_v32, %v217_v30 }
  0x47   : > { %v223_v35 = vadd.s32 %v222_v33, %v218_v31 }
  0x49   : > { %v224_v36 = vadd.s32 536870912, %v223_v35 }
  0x4b   : > { %v225_v37 = vshrl.u32 %v224_v36, 30 }
  0x4d   : > { %v226_v38 = vshll.u32 %v225_v37, 30  ;;  %v249_v55 = vsub.s32 4, %v225_v37 }
  0x4f   : > { %v227_v39 = vsub.s32 %v223_v35, %v226_v38  ;;  %v250_v58 = vsel %vm127_vm12, %v249_v55, %v225_v37 }
  0x50   : > { %v252_v61 = vsel %vm126_vm13, 0, %v250_v58 }
  0x51   : > { %vm228_vm10 = vcmp.lt.s32.totalorder %v227_v39, 0  ;;  %v229_v40 = vsub.s32 0, %v227_v39  ;;  %v269_v3 = vadd.s32 3, %v252_v61  ;;  %v424_v10 = vand.u32 3, %v252_v61 }
  0x53   : > { %v230_v41 = vsel %vm228_vm10, %v229_v40, %v227_v39  ;;  %v270_v9 = vand.u32 3, %v269_v3  ;;  %vm429_vm15 = vcmp.eq.s32.totalorder %v424_v10, 2  ;;  %vm426_vm2 = vcmp.eq.s32.totalorder %v424_v10, 0 }
  0x54   : > { %v231_v42 = vclz %v230_v41  ;;  %vm425_vm3 = vcmp.lt.s32.totalorder %v424_v10, 2 }
  0x55   : > { %vm275_vm14 = vcmp.eq.s32.totalorder %v270_v9, 2  ;;  %vm271_vm0 = vcmp.lt.s32.totalorder %v270_v9, 2  ;;  %vm272_vm1 = vcmp.eq.s32.totalorder %v270_v9, 0 }
  0x56   : > { %v523_v43 = vadd.s32 4294967294, %v231_v42 }
  0x58   : > { %vm524_vm11 = vcmp.lt.s32.totalorder %v523_v43, 0 }
  0x59   : > { %v234_v44 = vsel %vm524_vm11, 0, %v523_v43 }
  0x5a   : > { %v235_v45 = vsub.s32 32, %v234_v44  ;;  %v236_v46 = vshll.u32 %v227_v39, %v234_v44  ;;  %v239_v47 = vsub.s32 4294967266, %v234_v44 }
  0x5c   : > { %v237_v34 = vshrl.u32 %v219_v16, %v235_v45  ;;  %v240_v48 = vadd.s32 127, %v239_v47 }
  0x5e   : > { %v238_v49 = vor.u32 %v237_v34, %v236_v46  ;;  %v241_v50 = vshll.u32 %v240_v48, 23 }
  0x60   : > { %v242_v51 = vor.u32 4788187, %v241_v50  ;;  %v245_v52 = vcvt.s32.f32 %v238_v49 }
  0x62   : > { %v243_v53 = vand.u32 2147483647, %v242_v51 }
  0x64   : > { %v246_v54 = vmul.f32 %v245_v52, %v243_v53 }
  0x66   : > { %v247_v56 = vxor.u32 2147483648, %v246_v54 }
  0x68   : > { %v248_v57 = vsel %vm127_vm12, %v247_v56, %v246_v54 }
  0x69   : > { %v251_v59 = vsel %vm126_vm13, %v762_v6, %v248_v57 }
  0x6a   : > { %v253_v60 = vmul.f32 %v251_v59, %v251_v59 }
  0x6c   : > { %v254_v62 = vmul.f32 -0.001358992, %v253_v60  ;;  %v261_v63 = vmul.f32 -0.00019511016, %v253_v60 }
  0x6e   : > { %v255_v1 = vadd.f32 0.041655596, %v254_v62  ;;  %v262_v2 = vadd.f32 0.008332121, %v261_v63 }
  0x70   : > { %v256_v4 = vmul.f32 %v255_v1, %v253_v60  ;;  %v263_v5 = vmul.f32 %v262_v2, %v253_v60 }
  0x72   : > { %v257_v7 = vadd.f32 -0.4999988, %v256_v4  ;;  %v264_v8 = vadd.f32 -0.16666654, %v263_v5 }
  0x74   : > { %v258_v11 = vmul.f32 %v257_v7, %v253_v60  ;;  %v265_v12 = vmul.f32 %v264_v8, %v253_v60 }
  0x76   : > { %v259_v13 = vadd.f32 1.0, %v258_v11  ;;  %v266_v14 = vadd.f32 1.0, %v265_v12 }
  0x78   : > { %v267_v17 = vmul.f32 %v266_v14, %v251_v59  ;;  %v276_v18 = vxor.u32 2147483648, %v259_v13 }
  0x7a   : > { %v273_v19 = vxor.u32 2147483648, %v267_v17  ;;  %v277_v20 = vsel %vm275_vm14, %v276_v18, %v267_v17  ;;  %v431_v21 = vsel %vm429_vm15, %v276_v18, %v267_v17 }
  0x7c   : > { %v274_v0 = vsel %vm272_vm1, %v259_v13, %v273_v19  ;;  %v428_v22 = vsel %vm426_vm2, %v259_v13, %v273_v19 }
  0x7d   : > { %v278_v23 = vsel %vm271_vm0, %v274_v0, %v277_v20  ;;  %v432_v24 = vsel %vm425_vm3, %v428_v22, %v431_v21 }
  0x7e   : > { %v279_v25 = vsel %vm268_vm4, nan, %v278_v23  ;;  %v433_v26 = vsel %vm268_vm4, nan, %v432_v24 }
  0x7f   : > { %v436_v27 = vsel %vm124_vm5, %v279_v25, %v433_v26 }
  0x80   : > { %438 = vst.msk [vmem:[%s109_s30] sm:$0xff] %vm437_vm6, %v436_v27 }
  0x81   : > { %647 = shalt.err (!%p644_p7)
}
  0x82   : > { %536 = dma.vmem_to_hbm [thread:$0]  (%p744_p5), %s453_s2, 128, %s455_s3, %s440_s4  }
  0x83 PF: > { %p548_p8 = scmp.ge.s32.totalorder %s686_s9, 2  ;;  %s466_s20 = sand.u32 1, %s674_s6  }
  0x84   : > { %s467_s21 = scalar_lea.sflag [#allocation4], %s466_s20 }
  0x85   : > { %p543_p9 = pnand %p548_p8, %p748_p6 }
  0x87   : > { %p544_p10 = pneg %p543_p9 }
  0x89   : > { %669 = dma.done.wait (%p544_p10), %s467_s21, 128  }
  0x8a   : > { %671 = vsyncadd (%p544_p10), %s467_s21, 4294967168  ;;  %p12_p11 = scmp.ge.s32.totalorder %s731_s12, 4   ;;  %s856_s6 = smov %s678_s7 }
  0x8b   : > { %s857_s7 = smov %s682_s8  ;;  %s858_s8 = smov %s742_s15 }
  0x8c   : > { %s859_s9 = smov %s731_s12  ;;  %14 = sbr.rel (!%p12_p11) target bundleno = 4 (0x4), region = 61 }
  0x91   :  { %473 = vsyncpa [#allocation3], 1 }
  0x92   :  { %475 = vsyncpa [#allocation3 + $0x1], 1 }
  0x93   :  { %476 = vsyncpa [#allocation4], 1 }
  0x94   :  { %478 = vsyncpa [#allocation4 + $0x1], 1 }

</bundles_post_ra>
